<compile_context>
chip_gen: v5e
topology: v5e:2x2
jax: 0.10.0
libtpu: 0.0.40
codegen_flags: <defaults>
</compile_context>

<pallas_src>
import functools
import math

import jax
import jax.numpy as jnp
from jax import lax
from jax.experimental import pallas as pl
from jax.experimental.pallas import tpu as pltpu


_NEG_INF = -1e30  # large finite negative (avoids NaN from (-inf) - (-inf))
_VMEM_LIMIT_BYTES = 32 * 1024 * 1024  # > v5e 16MiB default, < v7x 64MiB physical


def _sublane_quantum(dtype):
    """Sublane quantum for the second-to-last block dim: 8 (f32), 16 (bf16), 32 (i8)."""
    return 8 * (4 // jnp.dtype(dtype).itemsize)


def _pick_tile(dim, target, quantum, max_full=2048):
    """Largest multiple-of-`quantum` divisor of dim that is <= target.

    Falls back to the full dimension only when it is small enough to be safe;
    otherwise raises (no silent giant-block VMEM blowups)."""
    if dim <= target:
        return dim
    t = (target // quantum) * quantum
    while t >= quantum:
        if dim % t == 0:
            return t
        t -= quantum
    if dim <= max_full:
        return dim
    raise ValueError(
        f"_pick_tile: no tile <= {target} with quantum {quantum} divides {dim}"
    )


# ----------------------------------------------------------------------------
# Tiled / pipelined matmul (fused QKV projection and output projection)
# ----------------------------------------------------------------------------
def _matmul_kernel(x_ref, w_ref, o_ref, acc_ref):
    @pl.when(pl.program_id(2) == 0)
    def _init():
        acc_ref[...] = jnp.zeros_like(acc_ref)

    acc_ref[...] += jnp.dot(
        x_ref[...], w_ref[...], preferred_element_type=jnp.float32
    )

    @pl.when(pl.program_id(2) == pl.num_programs(2) - 1)
    def _store():
        o_ref[...] = acc_ref[...].astype(o_ref.dtype)


def pallas_matmul(x, w, *, tm=512, tn=512, tk=1024):
    """x: (M, K), w: (K, N) -> (M, N), tiled with a float32 VMEM accumulator."""
    M, K = x.shape
    K2, N = w.shape
    assert K == K2
    tm = _pick_tile(M, tm, _sublane_quantum(x.dtype))
    tn = _pick_tile(N, tn, 128)
    tk = _pick_tile(K, tk, 128)
    grid = (M // tm, N // tn, K // tk)
    return pl.pallas_call(
        _matmul_kernel,
        out_shape=jax.ShapeDtypeStruct((M, N), x.dtype),
        grid_spec=pltpu.PrefetchScalarGridSpec(
            num_scalar_prefetch=0,
            grid=grid,
            in_specs=[
                pl.BlockSpec((tm, tk), lambda i, j, k: (i, k)),
                pl.BlockSpec((tk, tn), lambda i, j, k: (k, j)),
            ],
            out_specs=pl.BlockSpec((tm, tn), lambda i, j, k: (i, j)),
            scratch_shapes=[pltpu.VMEM((tm, tn), jnp.float32)],
        ),
        compiler_params=pltpu.CompilerParams(
            dimension_semantics=("parallel", "parallel", "arbitrary"),
            vmem_limit_bytes=_VMEM_LIMIT_BYTES,
        ),
    )(x, w)


# ----------------------------------------------------------------------------
# Flash-style causal SDPA with GQA head grouping and a lower-triangular
# tile schedule (no above-diagonal grid steps / DMAs at all).
# ----------------------------------------------------------------------------
def _flash_kernel(qtile_ref, ktile_ref,          # scalar-prefetch schedule (SMEM)
                  q_ref, k_ref, v_ref, o_ref,    # tiles
                  m_ref, l_ref, acc_ref,         # VMEM scratch
                  *, scale, tq, tkv, nkv_tiles):
    t = pl.program_id(2)
    qi = qtile_ref[t]
    ki = ktile_ref[t]
    q_start = qi * tq
    kv_start = ki * tkv

    # Each q-tile's run in the schedule starts at ki == 0.
    @pl.when(ki == 0)
    def _init():
        m_ref[...] = jnp.full_like(m_ref, _NEG_INF)
        l_ref[...] = jnp.zeros_like(l_ref)
        acc_ref[...] = jnp.zeros_like(acc_ref)

    q = q_ref[0]        # (n_rep, tq, D) -- all query heads of this KV group
    k = k_ref[0, 0]     # (tkv, D)
    v = v_ref[0, 0]     # (tkv, D)

    # Contract feature dims directly (no explicit k.T relayout).
    s = lax.dot_general(
        q, k, (((2,), (1,)), ((), ())),
        preferred_element_type=jnp.float32,
    ) * scale                                    # (n_rep, tq, tkv)

    def accumulate(scores):
        m_prev = m_ref[...]                      # (n_rep, tq, 1)
        m_new = jnp.maximum(m_prev, scores.max(axis=-1, keepdims=True))
        alpha = jnp.exp(m_prev - m_new)
        p = jnp.exp(scores - m_new)
        l_ref[...] = alpha * l_ref[...] + p.sum(axis=-1, keepdims=True)
        acc_ref[...] = alpha * acc_ref[...] + lax.dot_general(
            p.astype(v.dtype), v, (((2,), (0,)), ((), ())),
            preferred_element_type=jnp.float32,
        )
        m_ref[...] = m_new

    # Only tiles straddling the diagonal need the mask; everything else takes
    # the unmasked fast path (no iota / compare / select on the VPU).
    straddles = kv_start + (tkv - 1) > q_start

    @pl.when(straddles)
    def _masked():
        q_pos = q_start + lax.broadcasted_iota(jnp.int32, (tq, tkv), 0)
        k_pos = kv_start + lax.broadcasted_iota(jnp.int32, (tq, tkv), 1)
        accumulate(jnp.where((k_pos <= q_pos)[None], s, _NEG_INF))

    @pl.when(jnp.logical_not(straddles))
    def _unmasked():
        accumulate(s)

    # Last scheduled KV tile for this q tile -> normalize and write out.
    last_ki = jnp.minimum((q_start + tq - 1) // tkv, nkv_tiles - 1)

    @pl.when(ki == last_ki)
    def _finalize():
        # Exact divide: runs once per output tile, off the inner loop.
        o_ref[0] = (acc_ref[...] / l_ref[...]).astype(o_ref.dtype)


def _build_causal_schedule(nq_tiles, nkv_tiles, tq, tkv):
    """Enumerate only lower-triangular (qi, ki) tile pairs, ki-major per qi."""
    q_ids, k_ids = [], []
    for qi in range(nq_tiles):
        last = min((qi * tq + tq - 1) // tkv, nkv_tiles - 1)
        for ki in range(last + 1):
            q_ids.append(qi)
            k_ids.append(ki)
    return (jnp.asarray(q_ids, dtype=jnp.int32),
            jnp.asarray(k_ids, dtype=jnp.int32))


def pallas_sdpa(q, k, v, *, tq=128, tkv=256):
    """q: (B, H, S, D); k, v: (B, Hkv, S, D). Causal attention, GQA grouping."""
    B, H, S, D = q.shape
    _, Hkv, Sk, Dk = k.shape
    assert H % Hkv == 0 and S == Sk and D == Dk
    n_rep = H // Hkv
    sub_q = _sublane_quantum(q.dtype)
    tq = _pick_tile(S, tq, sub_q)
    tkv = _pick_tile(S, tkv, sub_q)
    nq_tiles = S // tq
    nkv_tiles = S // tkv

    q_ids, k_ids = _build_causal_schedule(nq_tiles, nkv_tiles, tq, tkv)
    n_steps = int(q_ids.shape[0])   # ~half of the dense nq*nk grid
    scale = 1.0 / math.sqrt(D)

    kernel = functools.partial(
        _flash_kernel, scale=scale, tq=tq, tkv=tkv, nkv_tiles=nkv_tiles
    )
    # Parallel extents B*Hkv shard across v7x's two TensorCores; the fused
    # lower-triangular (qi,ki) axis is the innermost "arbitrary" axis.
    grid = (B, Hkv, n_steps)

    return pl.pallas_call(
        kernel,
        out_shape=jax.ShapeDtypeStruct((B, H, S, D), q.dtype),
        grid_spec=pltpu.PrefetchScalarGridSpec(
            num_scalar_prefetch=2,
            grid=grid,
            in_specs=[
                # q block covers all n_rep query heads of KV group g -> the K/V
                # tiles below are fetched once per group (no repeat_kv).
                pl.BlockSpec((1, n_rep, tq, D),
                             lambda b, g, t, qt, kt: (b, g, qt[t], 0)),
                pl.BlockSpec((1, 1, tkv, D),
                             lambda b, g, t, qt, kt: (b, g, kt[t], 0)),
                pl.BlockSpec((1, 1, tkv, D),
                             lambda b, g, t, qt, kt: (b, g, kt[t], 0)),
            ],
            out_specs=pl.BlockSpec((1, n_rep, tq, D),
                                   lambda b, g, t, qt, kt: (b, g, qt[t], 0)),
            scratch_shapes=[
                pltpu.VMEM((n_rep, tq, 1), jnp.float32),   # running max
                pltpu.VMEM((n_rep, tq, 1), jnp.float32),   # running denom
                pltpu.VMEM((n_rep, tq, D), jnp.float32),   # output accumulator
            ],
        ),
        compiler_params=pltpu.CompilerParams(
            dimension_semantics=("parallel", "parallel", "arbitrary"),
            vmem_limit_bytes=_VMEM_LIMIT_BYTES,
        ),
    )(q_ids, k_ids, q, k, v)


# ----------------------------------------------------------------------------
# Glue: rotary embedding (interleaved pairs, matches torch apply_rotary_emb)
# ----------------------------------------------------------------------------
def apply_rotary_emb(xq, xk, freqs_cos, freqs_sin):
    # xq: (B, S, H, D), xk: (B, S, Hkv, D); freqs_*: (S, D//2)
    def rot(x):
        xr = x.astype(jnp.float32).reshape(x.shape[:-1] + (-1, 2))
        x_r, x_i = xr[..., 0], xr[..., 1]
        c = freqs_cos[None, :, None, :]
        s = freqs_sin[None, :, None, :]
        out_r = x_r * c - x_i * s
        out_i = x_r * s + x_i * c
        return jnp.stack([out_r, out_i], axis=-1).reshape(x.shape).astype(x.dtype)

    return rot(xq), rot(xk)


# ----------------------------------------------------------------------------
# Attention module (forward only; use_kv_cache=False path)
# ----------------------------------------------------------------------------
class Attention:
    def __init__(self, dim, n_heads, n_kv_heads, max_seq_len, key,
                 dtype=jnp.float32):
        self.n_heads = n_heads
        self.n_kv_heads = n_kv_heads
        self.n_rep = n_heads // n_kv_heads
        self.head_dim = dim // n_heads
        self.max_seq_len = max_seq_len

        k1, k2, k3, k4 = jax.random.split(key, 4)
        init = lambda k, shp: (0.02 * jax.random.normal(k, shp)).astype(dtype)
        # Stored already transposed: (in, out) so y = x @ W
        self.wq = init(k1, (dim, n_heads * self.head_dim))
        self.wk = init(k2, (dim, n_kv_heads * self.head_dim))
        self.wv = init(k3, (dim, n_kv_heads * self.head_dim))
        self.wo = init(k4, (n_heads * self.head_dim, dim))
        # Fused QKV weight: one matmul streams x from HBM once for q, k, v.
        self.wqkv = jnp.concatenate([self.wq, self.wk, self.wv], axis=1)

        # Kept only for the pure-JAX reference; the Pallas kernel builds the
        # causal mask in-register from iota (no SxS mask in HBM/VMEM).
        m = jnp.full((max_seq_len, max_seq_len), float("-inf"), dtype=jnp.float32)
        self.mask = jnp.triu(m, k=1)

    def __call__(self, x, freqs_cos, freqs_sin):
        # TODO(synk): kv-cache decode path (use_kv_cache=True, in-place cache_k /
        # cache_v update) not implemented; this covers the use_kv_cache=False branch.
        bsz, seqlen, dim = x.shape
        H, Hkv, D = self.n_heads, self.n_kv_heads, self.head_dim

        x2d = x.reshape(bsz * seqlen, dim)
        qkv = pallas_matmul(x2d, self.wqkv)          # single pass over x
        q_end = H * D
        k_end = q_end + Hkv * D
        xq = qkv[:, :q_end].reshape(bsz, seqlen, H, D)
        xk = qkv[:, q_end:k_end].reshape(bsz, seqlen, Hkv, D)
        xv = qkv[:, k_end:].reshape(bsz, seqlen, Hkv, D)

        xq, xk = apply_rotary_emb(xq, xk, freqs_cos, freqs_sin)

        # (B, S, H, D) -> (B, H, S, D): kept in XLA (head-sized blocks in the
        # last-two dims would violate the (8,128) block-tiling rule at small D).
        q = jnp.transpose(xq, (0, 2, 1, 3))
        k = jnp.transpose(xk, (0, 2, 1, 3))
        v = jnp.transpose(xv, (0, 2, 1, 3))

        out = pallas_sdpa(q, k, v)                   # (B, H, S, D), causal

        out = jnp.transpose(out, (0, 2, 1, 3)).reshape(bsz * seqlen, H * D)
        out = pallas_matmul(out, self.wo)
        return out.reshape(bsz, seqlen, dim), None, None


# ----------------------------------------------------------------------------
# Pure-JAX reference (for correctness check)
# ----------------------------------------------------------------------------
def reference_forward(attn, x, freqs_cos, freqs_sin):
    bsz, seqlen, dim = x.shape
    H, Hkv, D = attn.n_heads, attn.n_kv_heads, attn.head_dim
    xq = (x.reshape(-1, dim) @ attn.wq).reshape(bsz, seqlen, H, D)
    xk = (x.reshape(-1, dim) @ attn.wk).reshape(bsz, seqlen, Hkv, D)
    xv = (x.reshape(-1, dim) @ attn.wv).reshape(bsz, seqlen, Hkv, D)
    xq, xk = apply_rotary_emb(xq, xk, freqs_cos, freqs_sin)
    keys = jnp.repeat(xk, attn.n_rep, axis=2)
    values = jnp.repeat(xv, attn.n_rep, axis=2)
    q = jnp.transpose(xq, (0, 2, 1, 3))
    k = jnp.transpose(keys, (0, 2, 1, 3))
    v = jnp.transpose(values, (0, 2, 1, 3))
    scores = jnp.einsum("bhqd,bhkd->bhqk", q, k) / math.sqrt(D)
    scores = scores + attn.mask[:seqlen, :seqlen][None, None]
    p = jax.nn.softmax(scores, axis=-1)
    out = jnp.einsum("bhqk,bhkd->bhqd", p, v)
    out = jnp.transpose(out, (0, 2, 1, 3)).reshape(bsz, seqlen, H * D)
    return out @ attn.wo


if __name__ == "__main__":
    # Small ModelArgs-consistent shapes: dim=32, n_heads=4, n_kv_heads=2,
    # head_dim=8, max_seq_len=8, batch=2, seqlen=8.
    dim, n_heads, n_kv_heads, max_seq_len = 32, 4, 2, 8
    bsz, seqlen = 2, 8
    head_dim = dim // n_heads

    key = jax.random.PRNGKey(0)
    k_w, k_x = jax.random.split(key)
    attn = Attention(dim, n_heads, n_kv_heads, max_seq_len, k_w)

    x = jax.random.normal(k_x, (bsz, seqlen, dim), dtype=jnp.float32)

    # precomputed rotary frequencies, shapes (seqlen, head_dim // 2)
    theta = 10000.0
    inv_freq = 1.0 / (
        theta ** (jnp.arange(0, head_dim, 2, dtype=jnp.float32) / head_dim)
    )
    t = jnp.arange(seqlen, dtype=jnp.float32)
    freqs = jnp.outer(t, inv_freq)
    freqs_cos = jnp.cos(freqs)
    freqs_sin = jnp.sin(freqs)

    out, _, _ = attn(x, freqs_cos, freqs_sin)
    out = jax.block_until_ready(out)

    ref = reference_forward(attn, x, freqs_cos, freqs_sin)
    assert out.shape == (bsz, seqlen, dim)
    # Exact (non-approx) softmax normalization -> tight tolerance.
    assert jnp.allclose(out, ref, atol=1e-4, rtol=1e-4), "mismatch vs reference"

    print("KERNEL_OK")
</pallas_src>

<mosaic_0001>
module attributes {stable_mosaic.version = 11 : i64} {
  func.func @_matmul_kernel(%arg0: i32, %arg1: i32, %arg2: i32, %arg3: memref<16x32xf32, #tpu.memory_space<vmem>>, %arg4: memref<32x64xf32, #tpu.memory_space<vmem>>, %arg5: memref<16x64xf32, #tpu.memory_space<vmem>>, %arg6: memref<16x64xf32, #tpu.memory_space<vmem>>) attributes {dimension_semantics = [#tpu.dimension_semantics<parallel>, #tpu.dimension_semantics<parallel>, #tpu.dimension_semantics<arbitrary>], iteration_bounds = array<i64: 1, 1, 1>, scalar_prefetch = 0 : i64, scratch_operands = 1 : i64, tpu.core_type = #tpu.core_type<tc>, window_params = [{transform_indices = @transform_0, window_bounds = array<i64: 16, 32>}, {transform_indices = @transform_1, window_bounds = array<i64: 32, 64>}, {transform_indices = @transform_2, window_bounds = array<i64: 16, 64>}]} {
    %c0_i32 = arith.constant 0 : i32
    %0 = arith.cmpi eq, %arg2, %c0_i32 : i32
    %1 = arith.extui %0 : i1 to i32
    %c0_i32_0 = arith.constant 0 : i32
    %2 = arith.cmpi ne, %1, %c0_i32_0 : i32
    scf.if %2 {
      %cst_10 = arith.constant 0.000000e+00 : f32
      %12 = vector.broadcast %cst_10 : f32 to vector<16x64xf32>
      %c0_11 = arith.constant 0 : index
      %c0_12 = arith.constant 0 : index
      %13 = vector.load %arg6[%c0_11, %c0_12] : memref<16x64xf32, #tpu.memory_space<vmem>>, vector<16x64xf32>
      tpu.vector_store %arg6[%c0_11, %c0_12], %12 {strides = array<i32>} : memref<16x64xf32, #tpu.memory_space<vmem>>, vector<16x64xf32>,
    } else {
    }
    %c0 = arith.constant 0 : index
    %c0_1 = arith.constant 0 : index
    %3 = vector.load %arg6[%c0, %c0_1] : memref<16x64xf32, #tpu.memory_space<vmem>>, vector<16x64xf32>
    %c0_2 = arith.constant 0 : index
    %c0_3 = arith.constant 0 : index
    %4 = vector.load %arg3[%c0_2, %c0_3] : memref<16x32xf32, #tpu.memory_space<vmem>>, vector<16x32xf32>
    %c0_4 = arith.constant 0 : index
    %c0_5 = arith.constant 0 : index
    %5 = vector.load %arg4[%c0_4, %c0_5] : memref<32x64xf32, #tpu.memory_space<vmem>>, vector<32x64xf32>
    %cst = arith.constant dense<0.000000e+00> : vector<16x64xf32>
    %6 = tpu.matmul %4, %5, %cst {dimension_numbers = #tpu.dot_dimension_numbers<[1], [0], [0], [1], [0, 0, 1, 1], [], []>} : vector<16x32xf32>, vector<32x64xf32>, vector<16x64xf32> -> vector<16x64xf32>
    %7 = arith.addf %3, %6 : vector<16x64xf32>
    %c0_6 = arith.constant 0 : index
    %c0_7 = arith.constant 0 : index
    %8 = vector.load %arg6[%c0_6, %c0_7] : memref<16x64xf32, #tpu.memory_space<vmem>>, vector<16x64xf32>
    tpu.vector_store %arg6[%c0_6, %c0_7], %7 {strides = array<i32>} : memref<16x64xf32, #tpu.memory_space<vmem>>, vector<16x64xf32>,
    %c0_i32_8 = arith.constant 0 : i32
    %9 = arith.cmpi eq, %arg2, %c0_i32_8 : i32
    %10 = arith.extui %9 : i1 to i32
    %c0_i32_9 = arith.constant 0 : i32
    %11 = arith.cmpi ne, %10, %c0_i32_9 : i32
    scf.if %11 {
      %c0_10 = arith.constant 0 : index
      %c0_11 = arith.constant 0 : index
      %12 = vector.load %arg6[%c0_10, %c0_11] : memref<16x64xf32, #tpu.memory_space<vmem>>, vector<16x64xf32>
      %c0_12 = arith.constant 0 : index
      %c0_13 = arith.constant 0 : index
      %13 = vector.load %arg5[%c0_12, %c0_13] : memref<16x64xf32, #tpu.memory_space<vmem>>, vector<16x64xf32>
      tpu.vector_store %arg5[%c0_12, %c0_13], %12 {strides = array<i32>} : memref<16x64xf32, #tpu.memory_space<vmem>>, vector<16x64xf32>,
    } else {
    }
    return
  }
  func.func @transform_0(%arg0: i32, %arg1: i32, %arg2: i32) -> (i32, i32) {
    %c0_i32 = arith.constant 0 : i32
    return %arg0, %arg2 : i32, i32
  }
  func.func @transform_1(%arg0: i32, %arg1: i32, %arg2: i32) -> (i32, i32) {
    %c0_i32 = arith.constant 0 : i32
    return %arg2, %arg1 : i32, i32
  }
  func.func @transform_2(%arg0: i32, %arg1: i32, %arg2: i32) -> (i32, i32) {
    %c0_i32 = arith.constant 0 : i32
    return %arg0, %arg1 : i32, i32
  }
}

</mosaic_0001>

<bundles_post_ra>
// kernel: tpu_custom_call.1
= control target key start
LH: loop header
LB: loop body
LE: loop exit
PB: predicated region body
PF: predicated region fallthrough
CT: control target
= control target key end

     0   :  { %7 = vsyncpa [#allocation4], 0  ;;  %s256_s0 = inlined_call_operand.hbm [shape: f32[16,32], index: 0, kind: input, shape index: {}]   ;;  %s257_s1 = inlined_call_operand.hbm [shape: f32[32,64], index: 1, kind: input, shape index: {}]   ;;  %s258_s2 = inlined_call_operand.hbm [shape: f32[16,64], index: 2, kind: output, shape index: {}]  }
   0x1   :  { %8 = vsyncpa [#allocation7], 0 }
   0x2   :  { %9 = vsyncpa [#allocation5], 0  ;;  %s14_s11 = sshll.u32 %s256_s0, 4  ;;  %s211_s12 = smov [#allocation3]   ;;  %s15_s11 = int_to_ptr.hbm [resolvable:$true] %s14_s11 }
   0x3   :  { %s16_s13 = sshll.u32 %s211_s12, 4  ;;  %s27_s16 = sshll.u32 %s257_s1, 4  ;;  %s17_s13 = int_to_ptr.vmem [resolvable:$true] %s16_s13  ;;  %s28_s16 = int_to_ptr.hbm [resolvable:$true] %s27_s16 }
   0x4   :  { %s212_s17 = smov 128   ;;  %s213_s18 = smov 8  }
   0x5   :  { %22 = dma.hbm_to_vmem [thread:$0]  %s15_s11, 256, %s17_s13, [#allocation4], %s212_s17, %s212_s17, %s213_s18  }
   0x6   :  { %s214_s19 = smov [#allocation6]  }
   0x7   :  { %s29_s20 = sshll.u32 %s214_s19, 4  ;;  %s30_s20 = int_to_ptr.vmem [resolvable:$true] %s29_s20 }
   0x8   :  { %35 = dma.hbm_to_vmem [thread:$0]  %s28_s16, 512, %s30_s20, [#allocation7], %s212_s17, %s212_s17, %s213_s18  }
   0x9   :  { %205 = dma.done.wait [#allocation4], 256  }
   0xa   :  { %206 = vsyncadd [#allocation4], 4294967040 }
   0xb   :  { %207 = dma.done.wait [#allocation7], 512  }
   0xc   :  { %208 = vsyncadd [#allocation7], 4294966784  ;;  %vm48_vm0 = vcmask 523264   ;;  %v215_v0 = vmov 0.0   ;;  %v58_v1 = vld [vmem:[#allocation6 + $0x18] sm:$0xff]  ;;  %v57_v2 = vld [vmem:[#allocation6 + $0x10] sm:$0xff] }
   0xd   :  { %49 = vst.msk [vmem:[#allocation2] sm:$0xff] %vm48_vm0, %v215_v0  ;;  %78 = vmatpush.msra.mxu0 %v58_v1  ;;  %123 = vmatpush.msra.mxu1 %v58_v1  ;;  %v56_v3 = vld [vmem:[#allocation6 + $0x8] sm:$0xff]  ;;  %v55_v4 = vld [vmem:[#allocation6] sm:$0xff]  ;;  %v53_v5 = vld [vmem:[#allocation3] sm:$0xff]  ;;  %vm59_vm1 = vcmask 261120   ;;  %s216_s0 = smov [#allocation8]  }
   0xe   :  { %50 = vst.msk [vmem:[#allocation2 + $0x8] sm:$0xff] %vm48_vm0, %v215_v0  ;;  %v54_v6 = vld [vmem:[#allocation3 + $0x8] sm:$0xff]  ;;  %s105_s1 = sshll.u32 %s216_s0, 4  ;;  %s107_s23 = sshll.u32 %s258_s2, 4  ;;  %s106_s1 = int_to_ptr.vmem [resolvable:$true] %s105_s1  ;;  %s108_s23 = int_to_ptr.hbm [resolvable:$true] %s107_s23 }
   0xf   :  { %79 = vmatpush.msra.mxu0 %v57_v2  ;;  %124 = vmatpush.msra.mxu1 %v57_v2 }
  0x11   :  { %80 = vmatpush.msra.mxu0 %v56_v3  ;;  %125 = vmatpush.msra.mxu1 %v56_v3 }
  0x13   :  { %81 = vmatpush.msra.mxu0 %v55_v4  ;;  %126 = vmatpush.msra.mxu1 %v55_v4 }
  0x14   :  { %121 = vmatmul.msk.f32.vlgmr.msra.gmra.mxu0 %vm59_vm1, %v53_v5  ;;  %122 = vmatmul.msk.f32.vlgmr.msra.gmra.mxu1 %vm59_vm1, %v54_v6  ;;  %v51_v7 = vld [vmem:[#allocation2] sm:$0xff] }
  0x15   :  { %v52_v8 = vld [vmem:[#allocation2 + $0x8] sm:$0xff] }
  0x91   :  { %v83_v9 = vpop.f32.mrf.mxu0  ;;  %v86_v10 = vpop.f32.mrf.mxu1 }
  0x92   :  { %v89_v11 = vadd.f32 %v83_v9, %v51_v7  ;;  %v90_v12 = vadd.f32 %v86_v10, %v52_v8 }
  0x94   :  { %92 = vst.msk [vmem:[#allocation2] sm:$0xff] %vm48_vm0, %v89_v11 }
  0x95   :  { %93 = vst.msk [vmem:[#allocation2 + $0x8] sm:$0xff] %vm48_vm0, %v90_v12 }
  0x9b   :  { %v97_v13 = vld [vmem:[#allocation2] sm:$0xff] }
  0x9c   :  { %v98_v14 = vld [vmem:[#allocation2 + $0x8] sm:$0xff]  ;;  %99 = vst.msk [vmem:[#allocation8] sm:$0xff] %vm48_vm0, %v97_v13 }
  0x9d   :  { %100 = vst.msk [vmem:[#allocation8 + $0x8] sm:$0xff] %vm48_vm0, %v98_v14 }
  0x9e   :  { %113 = dma.vmem_to_hbm [thread:$0]  %s106_s1, 256, %s108_s23, [#allocation5], %s212_s17, %s212_s17, %s213_s18  }
  0x9f   :  { %209 = dma.done.wait [#allocation5], 256  }
  0xa0   :  { %210 = vsyncadd [#allocation5], 4294967040 }
  0xa1   :  { %118 = vsyncpa [#allocation4], 1 }
  0xa2   :  { %119 = vsyncpa [#allocation7], 1 }
  0xa3   :  { %120 = vsyncpa [#allocation5], 1 }

</bundles_post_ra>
